<compile_context>
chip_gen: v7x
topology: tpu7x:2x2x1
jax: 0.10.0
libtpu: 0.0.40
codegen_flags: <defaults>
</compile_context>

<pallas_src>
import jax
import jax.numpy as jnp
from jax.experimental import pallas as pl
from jax.experimental.pallas import tpu as pltpu


# ----------------------------- Pallas kernels ------------------------------- #
def _gcn_resident_kernel(adj_ref, s_ref, b_ref, out_ref):
    # One long MXU contraction per row tile; bias added in the same pass.
    out_ref[...] = (
        jnp.dot(adj_ref[...], s_ref[...], preferred_element_type=jnp.float32)
        + b_ref[...]
    ).astype(out_ref.dtype)


def _gcn_tiled_kernel(adj_ref, s_ref, b_ref, out_ref):
    # Accumulate straight into the f32 output block (VMEM-resident across k because
    # the output index_map returns (i, 0) for every k); init with the bias at k==0.
    k = pl.program_id(1)

    @pl.when(k == 0)
    def _init():
        out_ref[...] = jnp.broadcast_to(b_ref[...], out_ref.shape).astype(out_ref.dtype)

    out_ref[...] += jnp.dot(adj_ref[...], s_ref[...], preferred_element_type=jnp.float32)


# ------------------------------- helpers ------------------------------------ #
def _round_up(n, m):
    return ((n + m - 1) // m) * m


def _vmem_budget_bytes():
    """Generation-aware VMEM budget: ~80% of physical VMEM, capped at 100 MiB."""
    phys = 64 * 1024 * 1024  # conservative default = v7x per-TC VMEM
    try:
        phys = int(pltpu.get_tpu_info().vmem_capacity_bytes)
    except Exception:
        pass
    return int(min(int(phys * 0.80), 100 * 1024 * 1024))


# ------------------------------ Python wrapper ------------------------------ #
def graph_convolution_forward(x, adj, weight, bias, WF=None, flag=True,
                              compute_dtype=jnp.float32, force_tiled=False):
    """Pallas-backed equivalent of GraphConvolution.forward."""
    x = jnp.asarray(x, jnp.float32)
    adj = jnp.asarray(adj, jnp.float32)
    weight = jnp.asarray(weight, jnp.float32)
    bias = jnp.asarray(bias, jnp.float32)

    # Fold (x @ WF) @ weight -> x @ (WF @ weight): tiny matmul, done in XLA.
    if flag:
        assert WF is not None
        w_eff = jnp.dot(jnp.asarray(WF, jnp.float32), weight,
                        preferred_element_type=jnp.float32)
    else:
        w_eff = weight

    N = x.shape[0]
    out_features = w_eff.shape[1]
    F_pad = _round_up(out_features, 128)           # lane-dense output stores

    # support = x @ W_eff computed once in XLA (no per-row-tile recompute / x restream).
    support = jnp.dot(x, w_eff, preferred_element_type=jnp.float32)

    compute_dtype = jnp.dtype(compute_dtype)
    itemsize = compute_dtype.itemsize
    pad_mult = 8 if itemsize == 4 else 16          # sublane granule (bf16 packs 2 rows)

    budget = _vmem_budget_bytes()

    # Row-tile choice: whole block for tiny graphs; >= 2 row tiles for mid-size graphs
    # so both v7x TensorCores get work; 512 rows for large graphs (~85% HBM roofline).
    if N <= 256:
        TM = _round_up(max(N, 1), pad_mult)
    elif N <= 1024:
        TM = _round_up((N + 1) // 2, pad_mult)
    else:
        TM = 512
    N_pad = _round_up(N, TM)

    # Resident-support layout VMEM estimate (double-buffer everything conservatively).
    resident_bytes = (
        2 * TM * N_pad * itemsize        # adj slab stream
        + 2 * N_pad * F_pad * itemsize   # resident support
        + 2 * TM * F_pad * 4             # f32 output block
        + 2 * F_pad * 4                  # bias
    )
    use_resident = (not force_tiled) and (resident_bytes <= budget)

    if not use_resident:
        TM = TK = 256 if N <= 4096 else 512
        N_pad = _round_up(N, TM)

    # Single jnp.pad into the streamed dtype (no zeros + .at[].set HBM round trip).
    # Zero-padded adj columns keep padded support rows inert; padded output rows are
    # sliced off below.
    support_p = jnp.pad(support.astype(compute_dtype),
                        ((0, N_pad - N), (0, F_pad - out_features)))
    adj_p = jnp.pad(adj.astype(compute_dtype), ((0, N_pad - N), (0, N_pad - N)))
    bias_p = jnp.pad(bias[None, :], ((0, 0), (0, F_pad - out_features)))

    if use_resident:
        grid = (N_pad // TM,)
        out_padded = pl.pallas_call(
            _gcn_resident_kernel,
            out_shape=jax.ShapeDtypeStruct((N_pad, F_pad), jnp.float32),
            grid_spec=pltpu.PrefetchScalarGridSpec(
                num_scalar_prefetch=0,
                grid=grid,
                in_specs=[
                    pl.BlockSpec((TM, N_pad), lambda i: (i, 0)),      # adj row slab
                    pl.BlockSpec((N_pad, F_pad), lambda i: (0, 0)),   # resident support
                    pl.BlockSpec((1, F_pad), lambda i: (0, 0)),       # bias (resident)
                ],
                out_specs=pl.BlockSpec((TM, F_pad), lambda i: (i, 0)),
            ),
            compiler_params=pltpu.CompilerParams(
                dimension_semantics=("parallel",),
                vmem_limit_bytes=budget,
            ),
        )(adj_p, support_p, bias_p)
    else:
        # TODO(synk): for F_pad > ~512 add an output-feature grid axis to bound the
        # resident output block on v7x.
        grid = (N_pad // TM, N_pad // TK)
        out_padded = pl.pallas_call(
            _gcn_tiled_kernel,
            out_shape=jax.ShapeDtypeStruct((N_pad, F_pad), jnp.float32),
            grid_spec=pltpu.PrefetchScalarGridSpec(
                num_scalar_prefetch=0,
                grid=grid,
                in_specs=[
                    pl.BlockSpec((TM, TK), lambda i, k: (i, k)),      # adj tile
                    pl.BlockSpec((TK, F_pad), lambda i, k: (k, 0)),   # support slab
                    pl.BlockSpec((1, F_pad), lambda i, k: (0, 0)),    # bias (resident)
                ],
                out_specs=pl.BlockSpec((TM, F_pad), lambda i, k: (i, 0)),
            ),
            compiler_params=pltpu.CompilerParams(
                dimension_semantics=("parallel", "arbitrary"),
                vmem_limit_bytes=budget,
            ),
        )(adj_p, support_p, bias_p)

    return out_padded[:N, :out_features]


# -------------------------- deterministic parameters ------------------------ #
def xavier_normal(key, shape):
    fan_in, fan_out = shape
    std = (2.0 / (fan_in + fan_out)) ** 0.5
    return std * jax.random.normal(key, shape, dtype=jnp.float32)


def init_graph_convolution(key, in_features, out_features, features_selected, flag=True):
    k1, k2 = jax.random.split(key)
    params = {}
    if flag:
        params["WF"] = xavier_normal(k1, (in_features, features_selected))
        params["weight"] = xavier_normal(k2, (features_selected, out_features))
    else:
        params["WF"] = None
        params["weight"] = xavier_normal(k1, (in_features, out_features))
    params["bias"] = jnp.zeros((out_features,), dtype=jnp.float32)  # bias.data.fill_(0.0)
    return params


def _reference(x, adj, weight, bias, WF=None, flag=True):
    if flag:
        return adj @ ((x @ WF) @ weight) + bias
    return adj @ (x @ weight) + bias


# ----------------------------------- main ----------------------------------- #
if __name__ == "__main__":
    key = jax.random.PRNGKey(0)
    k_x, k_adj, k_p1, k_p2, k_x2, k_adj2, k_p3 = jax.random.split(key, 7)

    # Small shapes consistent with the module.
    N, in_features, features_selected, out_features = 8, 32, 16, 8

    x = jax.random.normal(k_x, (N, in_features), dtype=jnp.float32)
    adj = jax.random.normal(k_adj, (N, N), dtype=jnp.float32)

    # flag=True path: output = adj @ ((x @ WF) @ weight) + bias
    p_true = init_graph_convolution(k_p1, in_features, out_features, features_selected, flag=True)
    out_true = graph_convolution_forward(
        x, adj, p_true["weight"], p_true["bias"], WF=p_true["WF"], flag=True
    )
    jax.block_until_ready(out_true)
    ref_true = _reference(x, adj, p_true["weight"], p_true["bias"], WF=p_true["WF"], flag=True)
    assert out_true.shape == (N, out_features)
    assert jnp.allclose(out_true, ref_true, atol=1e-4, rtol=1e-4)

    # flag=False path: output = adj @ (x @ weight) + bias
    p_false = init_graph_convolution(k_p2, in_features, out_features, features_selected, flag=False)
    out_false = graph_convolution_forward(
        x, adj, p_false["weight"], p_false["bias"], WF=None, flag=False
    )
    jax.block_until_ready(out_false)
    ref_false = _reference(x, adj, p_false["weight"], p_false["bias"], flag=False)
    assert out_false.shape == (N, out_features)
    assert jnp.allclose(out_false, ref_false, atol=1e-4, rtol=1e-4)

    # Larger graph: exercises the resident-support path with >=2 row tiles + padding.
    N2 = 600
    x2 = jax.random.normal(k_x2, (N2, in_features), dtype=jnp.float32)
    adj2 = jax.random.normal(k_adj2, (N2, N2), dtype=jnp.float32) * (1.0 / N2)
    p_big = init_graph_convolution(k_p3, in_features, out_features, features_selected, flag=True)
    out_big = graph_convolution_forward(
        x2, adj2, p_big["weight"], p_big["bias"], WF=p_big["WF"], flag=True
    )
    jax.block_until_ready(out_big)
    ref_big = _reference(x2, adj2, p_big["weight"], p_big["bias"], WF=p_big["WF"], flag=True)
    assert out_big.shape == (N2, out_features)
    assert jnp.allclose(out_big, ref_big, atol=2e-3, rtol=2e-3)

    # Same graph through the fallback tiled path (multi-step k reduction, bias init at
    # k==0, direct accumulation into the output block).
    out_tiled = graph_convolution_forward(
        x2, adj2, p_big["weight"], p_big["bias"], WF=p_big["WF"], flag=True, force_tiled=True
    )
    jax.block_until_ready(out_tiled)
    assert jnp.allclose(out_tiled, ref_big, atol=2e-3, rtol=2e-3)

    # Optional bf16 streaming path (f32 accumulation) — relaxed tolerance.
    out_bf16 = graph_convolution_forward(
        x2, adj2, p_big["weight"], p_big["bias"], WF=p_big["WF"], flag=True,
        compute_dtype=jnp.bfloat16
    )
    jax.block_until_ready(out_bf16)
    assert jnp.allclose(out_bf16, ref_big, atol=2e-2, rtol=2e-2)

    print("KERNEL_OK")
</pallas_src>

<mosaic_0001>
module attributes {stable_mosaic.version = 11 : i64} {
  func.func @_gcn_resident_kernel(%arg0: i32, %arg1: memref<8x8xf32, #tpu.memory_space<vmem>>, %arg2: memref<8x128xf32, #tpu.memory_space<vmem>>, %arg3: memref<1x128xf32, #tpu.memory_space<vmem>>, %arg4: memref<8x128xf32, #tpu.memory_space<vmem>>) attributes {dimension_semantics = [#tpu.dimension_semantics<parallel>], iteration_bounds = array<i64: 1>, scalar_prefetch = 0 : i64, scratch_operands = 0 : i64, tpu.core_type = #tpu.core_type<tc>, window_params = [{transform_indices = @transform_0, window_bounds = array<i64: 8, 8>}, {pipeline_mode = #tpu.pipeline_mode<synchronous>, transform_indices = @transform_1, window_bounds = array<i64: 8, 128>}, {pipeline_mode = #tpu.pipeline_mode<synchronous>, transform_indices = @transform_2, window_bounds = array<i64: 1, 128>}, {transform_indices = @transform_3, window_bounds = array<i64: 8, 128>}]} {
    %c0 = arith.constant 0 : index
    %c0_0 = arith.constant 0 : index
    %0 = vector.load %arg1[%c0, %c0_0] : memref<8x8xf32, #tpu.memory_space<vmem>>, vector<8x8xf32>
    %c0_1 = arith.constant 0 : index
    %c0_2 = arith.constant 0 : index
    %1 = vector.load %arg2[%c0_1, %c0_2] : memref<8x128xf32, #tpu.memory_space<vmem>>, vector<8x128xf32>
    %cst = arith.constant dense<0.000000e+00> : vector<8x128xf32>
    %2 = tpu.matmul %0, %1, %cst {dimension_numbers = #tpu.dot_dimension_numbers<[1], [0], [0], [1], [0, 0, 1, 1], [], []>} : vector<8x8xf32>, vector<8x128xf32>, vector<8x128xf32> -> vector<8x128xf32>
    %c0_3 = arith.constant 0 : index
    %c0_4 = arith.constant 0 : index
    %3 = vector.load %arg3[%c0_3, %c0_4] : memref<1x128xf32, #tpu.memory_space<vmem>>, vector<1x128xf32>
    %4 = vector.broadcast %3 : vector<1x128xf32> to vector<8x128xf32>
    %5 = arith.addf %2, %4 : vector<8x128xf32>
    %c0_5 = arith.constant 0 : index
    %c0_6 = arith.constant 0 : index
    %6 = vector.load %arg4[%c0_5, %c0_6] : memref<8x128xf32, #tpu.memory_space<vmem>>, vector<8x128xf32>
    tpu.vector_store %arg4[%c0_5, %c0_6], %5 {strides = array<i32>} : memref<8x128xf32, #tpu.memory_space<vmem>>, vector<8x128xf32>,
    return
  }
  func.func @transform_0(%arg0: i32) -> (i32, i32) {
    %c0_i32 = arith.constant 0 : i32
    %c0_i32_0 = arith.constant 0 : i32
    return %arg0, %c0_i32 : i32, i32
  }
  func.func @transform_1(%arg0: i32) -> (i32, i32) {
    %c0_i32 = arith.constant 0 : i32
    %c0_i32_0 = arith.constant 0 : i32
    %c0_i32_1 = arith.constant 0 : i32
    return %c0_i32, %c0_i32_0 : i32, i32
  }
  func.func @transform_2(%arg0: i32) -> (i32, i32) {
    %c0_i32 = arith.constant 0 : i32
    %c0_i32_0 = arith.constant 0 : i32
    %c0_i32_1 = arith.constant 0 : i32
    return %c0_i32, %c0_i32_0 : i32, i32
  }
  func.func @transform_3(%arg0: i32) -> (i32, i32) {
    %c0_i32 = arith.constant 0 : i32
    %c0_i32_0 = arith.constant 0 : i32
    return %arg0, %c0_i32 : i32, i32
  }
}

</mosaic_0001>

<bundles_post_ra>
// kernel: tpu_custom_call.1
= control target key start
LH: loop header
LB: loop body
LE: loop exit
PB: predicated region body
PF: predicated region fallthrough
CT: control target
= control target key end

     0   :  { %8 = vsyncpa [#allocation3], 0  ;;  %s289_s0 = inlined_call_operand.hbm [shape: f32[8,8], index: 0, kind: input, shape index: {}]   ;;  %s290_s1 = inlined_call_operand.hbm [shape: f32[8,128], index: 1, kind: input, shape index: {}]   ;;  %s291_s2 = inlined_call_operand.vmem [shape: f32[1,128], index: 2, kind: input, shape index: {}]   ;;  %s292_s3 = inlined_call_operand.hbm [shape: f32[8,128], index: 3, kind: output, shape index: {}]  }
   0x1   :  { %9 = vsyncpa [#allocation6], 0 }
   0x2   :  { %10 = vsyncpa [#allocation4], 0  ;;  %s225_s12 = smov [#allocation2]   ;;  %s226_s14 = smov [#allocation5]  }
   0x3   :  { %s17_s13 = sshll.u32 %s225_s12, 4  ;;  %s27_s15 = sshll.u32 %s226_s14, 4  ;;  %s18_s13 = int_to_ptr.vmem [resolvable:$true] %s17_s13  ;;  %s28_s15 = int_to_ptr.vmem [resolvable:$true] %s27_s15 }
   0x4   :  { %s153_s18 = scalar_lea.hbm %s289_s0, 128 }
   0x5   :  { %p154_p0 = scmp.ne.s32.totalorder %s289_s0, %s153_s18  ;;  %p157_p1 = scmp.lt.u32.totalorder %s153_s18, %s289_s0 }
   0x7   :  { %p159_p2 = pnand %p157_p1, %p154_p0 }
   0x9   :  { %162 = shalt.err (!%p159_p2)
}
   0xa   :  { %s163_s23 = scalar_lea.vmem %s18_s13, 128  ;;  %p168_p4 = scmp.lt.s32.totalorder %s18_s13, %s18_s13 }
   0xb   :  { %p164_p3 = scmp.ne.s32.totalorder %s18_s13, %s163_s23  ;;  %p169_p5 = scmp.lt.s32.totalorder %s163_s23, %s163_s23 }
   0xd   :  { %p170_p6 = por %p169_p5, %p168_p4 }
   0xf   :  { %p171_p7 = pnand %p170_p6, %p164_p3 }
  0x11   :  { %174 = shalt.err (!%p171_p7)
}
  0x12   :  { %20 = dma.hbm_to_vmem [thread:$0]  %s289_s0, 128, %s18_s13, [#allocation3]  }
  0x13   :  { %s175_s28 = scalar_lea.hbm %s290_s1, 128 }
  0x14   :  { %p176_p8 = scmp.ne.s32.totalorder %s290_s1, %s175_s28  ;;  %p179_p9 = scmp.lt.u32.totalorder %s175_s28, %s290_s1 }
  0x16   :  { %p181_p10 = pnand %p179_p9, %p176_p8 }
  0x18   :  { %184 = shalt.err (!%p181_p10)
}
  0x19   :  { %s185_s6 = scalar_lea.vmem %s28_s15, 128  ;;  %p190_p12 = scmp.lt.s32.totalorder %s28_s15, %s28_s15 }
  0x1a   :  { %p186_p11 = scmp.ne.s32.totalorder %s28_s15, %s185_s6  ;;  %p191_p13 = scmp.lt.s32.totalorder %s185_s6, %s185_s6 }
  0x1c   :  { %p192_p0 = por %p191_p13, %p190_p12 }
  0x1e   :  { %p193_p1 = pnand %p192_p0, %p186_p11 }
  0x20   :  { %196 = shalt.err (!%p193_p1)
}
  0x21   :  { %30 = dma.hbm_to_vmem [thread:$0]  %s290_s1, 128, %s28_s15, [#allocation6]  }
  0x22   :  { %219 = dma.done.wait [#allocation3], 128  }
  0x23   :  { %220 = vsyncadd [#allocation3], 4294967168 }
  0x24   :  { %221 = dma.done.wait [#allocation6], 128  }
  0x25   :  { %222 = vsyncadd [#allocation6], 4294967168  ;;  %v227_v0 = vmov 0.0   ;;  %vm228_vm0 = vmmov 0   ;;  %vm48_vm1 = vcmask 64512   ;;  %v40_v1 = vld [vmem:[#allocation5] sm:$0xff] }
  0x26   :  { %143 = vmatprep.subr.mxu0 %v227_v0  ;;  %145 = vmatprep.mubr.msk.f32.mxu0 %vm228_vm0, %v227_v0  ;;  %v39_v2 = vld [vmem:[#allocation2] sm:$0xff]  ;;  %s229_s10 = smov [#allocation7]  }
  0x27   :  { %144 = vmatpush3.msra.mxu0 %v40_v1  ;;  %v139_v3 = vld [vmem:[%s291_s2] ss:$0 sm:$0xff]  ;;  %s129_s11 = sshll.u32 %s229_s10, 4  ;;  %s130_s11 = int_to_ptr.vmem [resolvable:$true] %s129_s11 }
  0x28   :  { %146 = vmatmul.mubr.msk.f32.vlgmr.msra.gmra.mrb[0].mxu0 %vm48_vm1, %v39_v2  ;;  %s197_s1 = scalar_lea.vmem %s130_s11, 128  ;;  %p202_p3 = scmp.lt.s32.totalorder %s130_s11, %s130_s11 }
  0x29   :  { %p198_p2 = scmp.ne.s32.totalorder %s130_s11, %s197_s1  ;;  %p203_p4 = scmp.lt.s32.totalorder %s197_s1, %s197_s1 }
  0x2b   :  { %p204_p5 = por %p203_p4, %p202_p3 }
  0x2d   :  { %p205_p6 = pnand %p204_p5, %p198_p2 }
  0xfb   :  { %v118_v4 = vpop.f32.mrb[0].mxu0 }
  0xfc   :  { %v119_v5 = vadd.f32 %v139_v3, %v118_v4  ;;  %v147_v6 = vpop.f32.mrb[1].mxu0 }
  0xfe   :  { %122 = vst [vmem:[#allocation7] sm:$0xff] %v119_v5 }
  0xff   :  { %208 = shalt.err (!%p205_p6)
}
 0x100   :  { %s209_s14 = scalar_lea.hbm %s292_s3, 128 }
 0x101   :  { %p210_p7 = scmp.ne.s32.totalorder %s292_s3, %s209_s14  ;;  %p213_p8 = scmp.lt.u32.totalorder %s209_s14, %s292_s3 }
 0x103   :  { %p215_p9 = pnand %p213_p8, %p210_p7 }
 0x105   :  { %218 = shalt.err (!%p215_p9)
}
 0x106   :  { %132 = dma.vmem_to_hbm [thread:$0]  %s130_s11, 128, %s292_s3, [#allocation4]  }
 0x107   :  { %223 = dma.done.wait [#allocation4], 128  }
 0x108   :  { %224 = vsyncadd [#allocation4], 4294967168 }
 0x109   :  { %136 = vsyncpa [#allocation3], 1 }
 0x10a   :  { %137 = vsyncpa [#allocation6], 1 }
 0x10b   :  { %138 = vsyncpa [#allocation4], 1 }

</bundles_post_ra>
